<compile_context>
chip_gen: v7x
topology: tpu7x:2x2x1
jax: 0.10.0
libtpu: 0.0.40
codegen_flags: <defaults>
</compile_context>

<pallas_src>
import functools

import jax
import jax.numpy as jnp
from jax.experimental import pallas as pl
from jax.experimental.pallas import tpu as pltpu


# ------------------------------ Pallas kernels ------------------------------


def qkv_proj_kernel(h_ref, wqkv_ref, q_ref, k_ref, v_ref, *, compute_dtype, nd):
    """Per qlen-tile: fused Q/K/V projection for every batch, stored batch-major."""
    x = h_ref[...].astype(compute_dtype)            # (tq, bsz, d_model)
    w = wqkv_ref[...]                                # (d_model, 3*nd)   (resident)
    bsz = x.shape[1]
    for b in range(bsz):                             # static loop, small bsz
        xb = x[:, b, :]                              # (tq, d_model)
        qkv = jnp.dot(xb, w, preferred_element_type=jnp.float32)       # (tq, 3*nd)
        q_ref[b] = qkv[:, :nd].astype(q_ref.dtype)                     # lane-dense
        k_ref[b] = qkv[:, nd:2 * nd].astype(k_ref.dtype)
        v_ref[b] = qkv[:, 2 * nd:].astype(v_ref.dtype)


def attn_kernel(q_ref, k_ref, v_ref, o_ref, *, n_head, d_head,
                compute_dtype, approx_recip):
    """Fused QK^T + softmax + PV for one batch and one qlen tile, all heads.

    q is already pre-scaled (softmax scale folded into Wq in the wrapper).
    """
    q = q_ref[...]                                   # (tq,   n_head*d_head)
    k = k_ref[...]                                   # (klen, n_head*d_head) resident
    v = v_ref[...]                                   # (klen, n_head*d_head) resident
    outs = []
    for h in range(n_head):                          # static loop over heads
        sl = slice(h * d_head, (h + 1) * d_head)
        qh = q[:, sl].astype(compute_dtype)
        kh = k[:, sl].astype(compute_dtype)
        s = jax.lax.dot_general(qh, kh, (((1,), (1,)), ((), ())),
                                preferred_element_type=jnp.float32)    # (tq, klen)
        m = jnp.max(s, axis=-1, keepdims=True)
        e = jnp.exp(s - m)
        denom = jnp.sum(e, axis=-1, keepdims=True)
        if approx_recip:
            p = e * pl.reciprocal(denom, approx=True)   # EUP slot, frees VALU
        else:
            p = e / denom                               # exact (fp32 verification)
        pv = jnp.dot(p.astype(compute_dtype), v[:, sl].astype(compute_dtype),
                     preferred_element_type=jnp.float32)               # (tq, d_head)
        outs.append(pv)
    # single lane-dense store of the full (tq, n_head*d_head) block
    o_ref[...] = jnp.concatenate(outs, axis=-1).astype(o_ref.dtype)


def out_ln_kernel(av_ref, h_ref, wo_ref, gamma_ref, beta_ref, o_ref, *,
                  compute_dtype, eps):
    """Fused o_net projection + residual add + LayerNorm, tiled over qlen."""
    av = av_ref[...]                                 # (bsz, tq, nd)
    hh = h_ref[...].astype(jnp.float32)              # (tq, bsz, d_model)
    wo = wo_ref[...]                                 # (nd, d_model)     (resident)
    gamma = gamma_ref[...]                           # (1, d_model)
    beta = beta_ref[...]
    bsz = av.shape[0]
    cols = []
    for b in range(bsz):
        proj = jnp.dot(av[b].astype(compute_dtype), wo,
                       preferred_element_type=jnp.float32)             # (tq, d_model)
        x = hh[:, b, :] + proj                       # residual
        mean = jnp.mean(x, axis=-1, keepdims=True)
        var = jnp.mean(jnp.square(x - mean), axis=-1, keepdims=True)
        ln = (x - mean) * jax.lax.rsqrt(var + eps)
        cols.append(ln * gamma + beta)
    o_ref[...] = jnp.stack(cols, axis=1).astype(o_ref.dtype)           # (tq, bsz, dm)


# ------------------------------ wrapper (JAX) -------------------------------


def _pick_q_tile(qlen, target=256):
    if qlen <= target:
        return qlen
    t = (target // 8) * 8
    while t >= 8:
        if qlen % t == 0:
            return t
        t -= 8
    return qlen


def multi_head_attn_forward(h, params, *, n_head, d_head, q_tile=None,
                            use_bf16=True):
    qlen, bsz, d_model = h.shape
    nd = n_head * d_head
    scale = 1.0 / (d_head ** 0.5)
    f32 = jnp.float32
    cdt = jnp.bfloat16 if use_bf16 else jnp.float32   # MXU operand dtype
    store_dt = cdt                                    # q/k/v/av activations in HBM

    if q_tile is None:
        q_tile = _pick_q_tile(qlen)
    assert qlen % q_tile == 0 and (q_tile % 8 == 0 or q_tile == qlen)
    n_qt = qlen // q_tile

    # weights pre-transposed, pre-scaled and pre-cast once (reused every tile).
    # softmax scale is folded into Wq -> zero in-kernel scaling cost.
    wq_t = params["W_q"].T * scale                    # (d_model, nd)
    wkv_t = params["W_kv"].T                          # (d_model, 2*nd)
    wqkv = jnp.concatenate([wq_t, wkv_t], axis=1).astype(cdt)   # (d_model, 3*nd)
    wo_t = params["W_o"].T.astype(cdt)                # (nd, d_model)
    gamma = params["ln_gamma"].reshape(1, d_model).astype(f32)
    beta = params["ln_beta"].reshape(1, d_model).astype(f32)

    vmem_limit = 64 * 1024 * 1024
    cp1 = pltpu.CompilerParams(dimension_semantics=("parallel",),
                               vmem_limit_bytes=vmem_limit)
    cp2 = pltpu.CompilerParams(dimension_semantics=("parallel", "parallel"),
                               vmem_limit_bytes=vmem_limit)

    # ---- K1: fused QKV projection, tiled over qlen ----
    q, k, v = pl.pallas_call(
        functools.partial(qkv_proj_kernel, compute_dtype=cdt, nd=nd),
        grid=(n_qt,),
        in_specs=[
            pl.BlockSpec((q_tile, bsz, d_model), lambda i: (i, 0, 0)),
            pl.BlockSpec((d_model, 3 * nd), lambda i: (0, 0)),
        ],
        out_specs=[
            pl.BlockSpec((bsz, q_tile, nd), lambda i: (0, i, 0)),
            pl.BlockSpec((bsz, q_tile, nd), lambda i: (0, i, 0)),
            pl.BlockSpec((bsz, q_tile, nd), lambda i: (0, i, 0)),
        ],
        out_shape=[
            jax.ShapeDtypeStruct((bsz, qlen, nd), store_dt),
            jax.ShapeDtypeStruct((bsz, qlen, nd), store_dt),
            jax.ShapeDtypeStruct((bsz, qlen, nd), store_dt),
        ],
        compiler_params=cp1,
    )(h, wqkv)

    # ---- K2: fused attention (QK^T + softmax + PV), grid (batch, qlen tile) ----
    av = pl.pallas_call(
        functools.partial(attn_kernel, n_head=n_head, d_head=d_head,
                          compute_dtype=cdt, approx_recip=use_bf16),
        grid=(bsz, n_qt),
        in_specs=[
            pl.BlockSpec((None, q_tile, nd), lambda b, i: (b, i, 0)),
            pl.BlockSpec((None, qlen, nd), lambda b, i: (b, 0, 0)),   # K resident
            pl.BlockSpec((None, qlen, nd), lambda b, i: (b, 0, 0)),   # V resident
        ],
        out_specs=pl.BlockSpec((None, q_tile, nd), lambda b, i: (b, i, 0)),
        out_shape=jax.ShapeDtypeStruct((bsz, qlen, nd), store_dt),
        compiler_params=cp2,
    )(q, k, v)

    # ---- K3: output projection + residual + LayerNorm, tiled over qlen ----
    out = pl.pallas_call(
        functools.partial(out_ln_kernel, compute_dtype=cdt, eps=1e-5),
        grid=(n_qt,),
        in_specs=[
            pl.BlockSpec((bsz, q_tile, nd), lambda i: (0, i, 0)),
            pl.BlockSpec((q_tile, bsz, d_model), lambda i: (i, 0, 0)),
            pl.BlockSpec((nd, d_model), lambda i: (0, 0)),
            pl.BlockSpec((1, d_model), lambda i: (0, 0)),
            pl.BlockSpec((1, d_model), lambda i: (0, 0)),
        ],
        out_specs=pl.BlockSpec((q_tile, bsz, d_model), lambda i: (i, 0, 0)),
        out_shape=jax.ShapeDtypeStruct((qlen, bsz, d_model), f32),
        compiler_params=cp1,
    )(av, h, wo_t, gamma, beta)
    return out


# --------------------------- pure-JAX reference -----------------------------


def reference_forward(h, params, *, n_head, d_head):
    qlen, bsz, d_model = h.shape
    nd = n_head * d_head
    scale = 1.0 / (d_head ** 0.5)
    q = h @ params["W_q"].T
    kv = h @ params["W_kv"].T
    k, v = jnp.split(kv, 2, axis=-1)
    q = q.reshape(qlen, bsz, n_head, d_head)
    k = k.reshape(qlen, bsz, n_head, d_head)
    v = v.reshape(qlen, bsz, n_head, d_head)
    score = jnp.einsum("ibnd,jbnd->ijbn", q, k) * scale
    prob = jax.nn.softmax(score, axis=1)
    av = jnp.einsum("ijbn,jbnd->ibnd", prob, v).reshape(qlen, bsz, nd)
    attn_out = av @ params["W_o"].T
    x = h + attn_out
    mean = x.mean(-1, keepdims=True)
    var = ((x - mean) ** 2).mean(-1, keepdims=True)
    return (x - mean) / jnp.sqrt(var + 1e-5) * params["ln_gamma"] + params["ln_beta"]


# ----------------------------------- main -----------------------------------


if __name__ == "__main__":
    n_head, d_head, d_model = 2, 8, 32
    qlen, bsz = 16, 2
    nd = n_head * d_head

    key = jax.random.PRNGKey(0)
    ks = jax.random.split(key, 6)
    params = {
        "W_q": 0.05 * jax.random.normal(ks[0], (nd, d_model), jnp.float32),
        "W_kv": 0.05 * jax.random.normal(ks[1], (2 * nd, d_model), jnp.float32),
        "W_o": 0.05 * jax.random.normal(ks[2], (d_model, nd), jnp.float32),
        "ln_gamma": 1.0 + 0.1 * jax.random.normal(ks[3], (d_model,), jnp.float32),
        "ln_beta": 0.1 * jax.random.normal(ks[4], (d_model,), jnp.float32),
    }
    h = jax.random.normal(ks[5], (qlen, bsz, d_model), jnp.float32)

    ref = reference_forward(h, params, n_head=n_head, d_head=d_head)

    # fp32 compute path: tight numerical check against the module semantics.
    out_f32 = multi_head_attn_forward(h, params, n_head=n_head, d_head=d_head,
                                      q_tile=8, use_bf16=False)
    out_f32 = jax.block_until_ready(out_f32)
    assert out_f32.shape == (qlen, bsz, d_model)
    assert jnp.allclose(out_f32, ref, atol=1e-4, rtol=1e-4), (
        f"fp32 max abs err {jnp.max(jnp.abs(out_f32 - ref))}")

    # bf16 MXU path (perf default): fp32 accumulation, looser tolerance.
    out_bf16 = multi_head_attn_forward(h, params, n_head=n_head, d_head=d_head,
                                       q_tile=8, use_bf16=True)
    out_bf16 = jax.block_until_ready(out_bf16)
    assert jnp.allclose(out_bf16.astype(jnp.float32), ref, atol=5e-2, rtol=5e-2), (
        f"bf16 max abs err {jnp.max(jnp.abs(out_bf16.astype(jnp.float32) - ref))}")

    print("KERNEL_OK")
</pallas_src>

<mosaic_0001>
module attributes {stable_mosaic.version = 11 : i64} {
  func.func @qkv_proj_kernel(%arg0: i32, %arg1: memref<8x2x32xf32, #tpu.memory_space<vmem>>, %arg2: memref<32x48xf32, #tpu.memory_space<vmem>>, %arg3: memref<2x8x16xf32, #tpu.memory_space<vmem>>, %arg4: memref<2x8x16xf32, #tpu.memory_space<vmem>>, %arg5: memref<2x8x16xf32, #tpu.memory_space<vmem>>) attributes {dimension_semantics = [#tpu.dimension_semantics<parallel>], iteration_bounds = array<i64: 2>, scalar_prefetch = 0 : i64, scratch_operands = 0 : i64, tpu.core_type = #tpu.core_type<tc>, window_params = [{transform_indices = @transform_0, window_bounds = array<i64: 8, 2, 32>}, {pipeline_mode = #tpu.pipeline_mode<synchronous>, transform_indices = @transform_1, window_bounds = array<i64: 32, 48>}, {transform_indices = @transform_2, window_bounds = array<i64: 2, 8, 16>}, {transform_indices = @transform_3, window_bounds = array<i64: 2, 8, 16>}, {transform_indices = @transform_4, window_bounds = array<i64: 2, 8, 16>}]} {
    %c0 = arith.constant 0 : index
    %c0_0 = arith.constant 0 : index
    %c0_1 = arith.constant 0 : index
    %0 = vector.load %arg1[%c0, %c0_0, %c0_1] : memref<8x2x32xf32, #tpu.memory_space<vmem>>, vector<8x2x32xf32>
    %c0_2 = arith.constant 0 : index
    %c0_3 = arith.constant 0 : index
    %1 = vector.load %arg2[%c0_2, %c0_3] : memref<32x48xf32, #tpu.memory_space<vmem>>, vector<32x48xf32>
    %2 = vector.extract_strided_slice %0 {offsets = [0, 0, 0], sizes = [8, 1, 32], strides = [1, 1, 1]} : vector<8x2x32xf32> to vector<8x1x32xf32>
    %3 = vector.shape_cast %2 : vector<8x1x32xf32> to vector<8x32xf32>
    %cst = arith.constant dense<0.000000e+00> : vector<8x48xf32>
    %4 = tpu.matmul %3, %1, %cst {dimension_numbers = #tpu.dot_dimension_numbers<[1], [0], [0], [1], [0, 0, 1, 1], [], []>} : vector<8x32xf32>, vector<32x48xf32>, vector<8x48xf32> -> vector<8x48xf32>
    %5 = vector.extract_strided_slice %4 {offsets = [0, 0], sizes = [8, 16], strides = [1, 1]} : vector<8x48xf32> to vector<8x16xf32>
    %c0_4 = arith.constant 0 : index
    %c0_5 = arith.constant 0 : index
    %c0_6 = arith.constant 0 : index
    %6 = vector.load %arg3[%c0_4, %c0_5, %c0_6] : memref<2x8x16xf32, #tpu.memory_space<vmem>>, vector<1x8x16xf32>
    %7 = vector.shape_cast %6 : vector<1x8x16xf32> to vector<8x16xf32>
    %8 = vector.shape_cast %5 : vector<8x16xf32> to vector<1x8x16xf32>
    tpu.vector_store %arg3[%c0_4, %c0_5, %c0_6], %8 {strides = array<i32>} : memref<2x8x16xf32, #tpu.memory_space<vmem>>, vector<1x8x16xf32>,
    %9 = vector.extract_strided_slice %4 {offsets = [0, 16], sizes = [8, 16], strides = [1, 1]} : vector<8x48xf32> to vector<8x16xf32>
    %c0_7 = arith.constant 0 : index
    %c0_8 = arith.constant 0 : index
    %c0_9 = arith.constant 0 : index
    %10 = vector.load %arg4[%c0_7, %c0_8, %c0_9] : memref<2x8x16xf32, #tpu.memory_space<vmem>>, vector<1x8x16xf32>
    %11 = vector.shape_cast %10 : vector<1x8x16xf32> to vector<8x16xf32>
    %12 = vector.shape_cast %9 : vector<8x16xf32> to vector<1x8x16xf32>
    tpu.vector_store %arg4[%c0_7, %c0_8, %c0_9], %12 {strides = array<i32>} : memref<2x8x16xf32, #tpu.memory_space<vmem>>, vector<1x8x16xf32>,
    %13 = vector.extract_strided_slice %4 {offsets = [0, 32], sizes = [8, 16], strides = [1, 1]} : vector<8x48xf32> to vector<8x16xf32>
    %c0_10 = arith.constant 0 : index
    %c0_11 = arith.constant 0 : index
    %c0_12 = arith.constant 0 : index
    %14 = vector.load %arg5[%c0_10, %c0_11, %c0_12] : memref<2x8x16xf32, #tpu.memory_space<vmem>>, vector<1x8x16xf32>
    %15 = vector.shape_cast %14 : vector<1x8x16xf32> to vector<8x16xf32>
    %16 = vector.shape_cast %13 : vector<8x16xf32> to vector<1x8x16xf32>
    tpu.vector_store %arg5[%c0_10, %c0_11, %c0_12], %16 {strides = array<i32>} : memref<2x8x16xf32, #tpu.memory_space<vmem>>, vector<1x8x16xf32>,
    %17 = vector.extract_strided_slice %0 {offsets = [0, 1, 0], sizes = [8, 1, 32], strides = [1, 1, 1]} : vector<8x2x32xf32> to vector<8x1x32xf32>
    %18 = vector.shape_cast %17 : vector<8x1x32xf32> to vector<8x32xf32>
    %cst_13 = arith.constant dense<0.000000e+00> : vector<8x48xf32>
    %19 = tpu.matmul %18, %1, %cst_13 {dimension_numbers = #tpu.dot_dimension_numbers<[1], [0], [0], [1], [0, 0, 1, 1], [], []>} : vector<8x32xf32>, vector<32x48xf32>, vector<8x48xf32> -> vector<8x48xf32>
    %20 = vector.extract_strided_slice %19 {offsets = [0, 0], sizes = [8, 16], strides = [1, 1]} : vector<8x48xf32> to vector<8x16xf32>
    %c1 = arith.constant 1 : index
    %c0_14 = arith.constant 0 : index
    %c0_15 = arith.constant 0 : index
    %21 = vector.load %arg3[%c1, %c0_14, %c0_15] : memref<2x8x16xf32, #tpu.memory_space<vmem>>, vector<1x8x16xf32>
    %22 = vector.shape_cast %21 : vector<1x8x16xf32> to vector<8x16xf32>
    %23 = vector.shape_cast %20 : vector<8x16xf32> to vector<1x8x16xf32>
    tpu.vector_store %arg3[%c1, %c0_14, %c0_15], %23 {strides = array<i32>} : memref<2x8x16xf32, #tpu.memory_space<vmem>>, vector<1x8x16xf32>,
    %24 = vector.extract_strided_slice %19 {offsets = [0, 16], sizes = [8, 16], strides = [1, 1]} : vector<8x48xf32> to vector<8x16xf32>
    %c1_16 = arith.constant 1 : index
    %c0_17 = arith.constant 0 : index
    %c0_18 = arith.constant 0 : index
    %25 = vector.load %arg4[%c1_16, %c0_17, %c0_18] : memref<2x8x16xf32, #tpu.memory_space<vmem>>, vector<1x8x16xf32>
    %26 = vector.shape_cast %25 : vector<1x8x16xf32> to vector<8x16xf32>
    %27 = vector.shape_cast %24 : vector<8x16xf32> to vector<1x8x16xf32>
    tpu.vector_store %arg4[%c1_16, %c0_17, %c0_18], %27 {strides = array<i32>} : memref<2x8x16xf32, #tpu.memory_space<vmem>>, vector<1x8x16xf32>,
    %28 = vector.extract_strided_slice %19 {offsets = [0, 32], sizes = [8, 16], strides = [1, 1]} : vector<8x48xf32> to vector<8x16xf32>
    %c1_19 = arith.constant 1 : index
    %c0_20 = arith.constant 0 : index
    %c0_21 = arith.constant 0 : index
    %29 = vector.load %arg5[%c1_19, %c0_20, %c0_21] : memref<2x8x16xf32, #tpu.memory_space<vmem>>, vector<1x8x16xf32>
    %30 = vector.shape_cast %29 : vector<1x8x16xf32> to vector<8x16xf32>
    %31 = vector.shape_cast %28 : vector<8x16xf32> to vector<1x8x16xf32>
    tpu.vector_store %arg5[%c1_19, %c0_20, %c0_21], %31 {strides = array<i32>} : memref<2x8x16xf32, #tpu.memory_space<vmem>>, vector<1x8x16xf32>,
    return
  }
  func.func @transform_0(%arg0: i32) -> (i32, i32, i32) {
    %c0_i32 = arith.constant 0 : i32
    %c0_i32_0 = arith.constant 0 : i32
    %c0_i32_1 = arith.constant 0 : i32
    return %arg0, %c0_i32, %c0_i32_0 : i32, i32, i32
  }
  func.func @transform_1(%arg0: i32) -> (i32, i32) {
    %c0_i32 = arith.constant 0 : i32
    %c0_i32_0 = arith.constant 0 : i32
    %c0_i32_1 = arith.constant 0 : i32
    return %c0_i32, %c0_i32_0 : i32, i32
  }
  func.func @transform_2(%arg0: i32) -> (i32, i32, i32) {
    %c0_i32 = arith.constant 0 : i32
    %c0_i32_0 = arith.constant 0 : i32
    %c0_i32_1 = arith.constant 0 : i32
    return %c0_i32, %arg0, %c0_i32_0 : i32, i32, i32
  }
  func.func @transform_3(%arg0: i32) -> (i32, i32, i32) {
    %c0_i32 = arith.constant 0 : i32
    %c0_i32_0 = arith.constant 0 : i32
    %c0_i32_1 = arith.constant 0 : i32
    return %c0_i32, %arg0, %c0_i32_0 : i32, i32, i32
  }
  func.func @transform_4(%arg0: i32) -> (i32, i32, i32) {
    %c0_i32 = arith.constant 0 : i32
    %c0_i32_0 = arith.constant 0 : i32
    %c0_i32_1 = arith.constant 0 : i32
    return %c0_i32, %arg0, %c0_i32_0 : i32, i32, i32
  }
}

</mosaic_0001>

<bundles_post_ra>
// kernel: tpu_custom_call.1
= control target key start
LH: loop header
LB: loop body
LE: loop exit
PB: predicated region body
PF: predicated region fallthrough
CT: control target
= control target key end

     0   :  { %10 = vsyncpa [#allocation3], 0  ;;  %s1371_s0 = inlined_call_operand.hbm [shape: f32[16,2,32], index: 0, kind: input, shape index: {}]   ;;  %s1372_s1 = inlined_call_operand.hbm [shape: f32[32,48], index: 1, kind: input, shape index: {}]   ;;  %s1373_s2 = inlined_call_operand.hbm [shape: f32[2,16,16], index: 2, kind: output, shape index: {0}]   ;;  %s1374_s3 = inlined_call_operand.hbm [shape: f32[2,16,16], index: 3, kind: output, shape index: {1}]   ;;  %s1375_s4 = inlined_call_operand.hbm [shape: f32[2,16,16], index: 4, kind: output, shape index: {2}]  }
   0x1   :  { %12 = vsyncpa [#allocation3 + $0x1], 0 }
   0x2   :  { %13 = vsyncpa [#allocation6], 0 }
   0x3   :  { %14 = vsyncpa [#allocation4], 0 }
   0x4   :  { %16 = vsyncpa [#allocation4 + $0x1], 0 }
   0x5   :  { %17 = vsyncpa [#allocation9], 0 }
   0x6   :  { %19 = vsyncpa [#allocation9 + $0x1], 0  ;;  %s1053_s15 = smov 0   ;;  %s1055_s16 = smov 0  }
   0x7   :  { %s1057_s17 = smov 0   ;;  %s1059_s18 = smov 0  }
   0x8 LB: > { %s1074_s19 = sadd.s32 4294967295, %s1009_s18   ;;  %s1379_s20 = sadd.s32 4294967294, %s1009_s18   ;;  %s1009_s18 = sphi %s1059_s18, %s1397_s18   ;;  %s1005_s17 = sphi %s1057_s17, %s1396_s17   ;;  %s1001_s16 = sphi %s1055_s16, %s1395_s16   ;;  %s997_s15 = sphi %s1053_s15, %s1394_s15  }
   0x9   : > { %p45_p0 = scmp.ne.s32.totalorder %s1001_s16, %s997_s15  ;;  %p1376_p1 = scmp.eq.s32.totalorder %s1074_s19, 0 }
   0xa   : > { %p96_p3 = scmp.eq.s32.totalorder %s1379_s20, 1  ;;  %p672_p5 = scmp.ge.s32.totalorder %s1009_s18, 1 }
   0xb   : > { %p1085_p4 = por %p1376_p1, %p45_p0  ;;  %p155_p7 = scmp.lt.s32.totalorder %s1009_s18, 3 }
   0xc   : > { %p1090_p6 = por %p96_p3, %p45_p0  ;;  %s1011_s24 = smov [#allocation5]  }
   0xd   : > { %s1380_s21 = scalar_select %p1085_p4, 1, 0 }
   0xe   : > { %s1381_s22 = scalar_select %p1090_p6, 1, 0 }
   0xf   : > { %p1095_p8 = pnand %p672_p5, %p155_p7  ;;  %s167_s25 = sshll.u32 %s1011_s24, 4  ;;  %s1099_s25 = int_to_ptr.vmem [resolvable:$true] %s167_s25 }
  0x10   : > { %s1111_s27 = sadd.s32 1, %s1009_s18   ;;  %s32_s28 = sadd.s32 1, %s1005_s17 }
  0x11   : > { %s1382_s23 = scalar_select %p1095_p8, 1, 0 }
  0x12   : > { %p754_p9 = pneg %p1095_p8  ;;  %s29_s29 = ssub.s32 %s1009_s18, %s1111_s27 }
  0x13   : > { %s821_s6 = scalar_lea.hbm %s1372_s1, 512 }
  0x14   : > { %p1106_p11 = pnand %p754_p9, %p1376_p1  ;;  %p822_p12 = scmp.ne.s32.totalorder %s1372_s1, %s821_s6 }
  0x15   : > { %p828_p5 = scmp.lt.u32.totalorder %s821_s6, %s1372_s1 }
  0x16   : > { %p823_p13 = pneg %p1106_p11 }
  0x18   : > { %p824_p0 = pnand %p823_p13, %p822_p12 }
  0x1a   : > { %p825_p3 = pneg %p824_p0 }
  0x1c   : > { %p830_p7 = pnand %p828_p5, %p825_p3 }
  0x1e   : > { %833 = shalt.err (!%p830_p7)
}
  0x1f   : > { %s834_s11 = scalar_lea.vmem %s1099_s25, 512  ;;  %p842_p2 = scmp.lt.s32.totalorder %s1099_s25, %s1099_s25 }
  0x20   : > { %p835_p9 = scmp.ne.s32.totalorder %s1099_s25, %s834_s11  ;;  %p843_p6 = scmp.lt.s32.totalorder %s834_s11, %s834_s11 }
  0x22   : > { %p837_p10 = pnand %p835_p9, %p823_p13  ;;  %p844_p4 = por %p843_p6, %p842_p2 }
  0x24   : > { %p838_p1 = pneg %p837_p10 }
  0x26   : > { %p845_p8 = pnand %p844_p4, %p838_p1 }
  0x28   : > { %848 = shalt.err (!%p845_p8)
}
  0x29   : > { %s1012_s12 = smov 128   ;;  %s1013_s13 = smov 8  }
  0x2a   : > { %757 = dma.hbm_to_vmem [thread:$0]  (!%p1106_p11), %s1372_s1, 512, %s1099_s25, [#allocation6], %s1012_s12, %s1012_s12, %s1013_s13  }
  0x2b   : > { %p30_p2 = scmp.eq.s32.totalorder %s29_s29, 0  ;;  %p39_p1 = scmp.ne.s32.totalorder %s1005_s17, %s1001_s16 }
  0x2c   : > { %p40_p4 = scmp.eq.s32.totalorder %s1009_s18, 0  ;;  %p773_p6 = scmp.lt.s32.totalorder %s1009_s18, 2 }
  0x2d   : > { %s1142_s30 = scalar_select %p30_p2, %s1005_s17, %s32_s28  }
  0x2e   : > { %p41_p8 = por %p40_p4, %p39_p1  ;;  %p1384_p10 = scmp.eq.s32.totalorder %s1074_s19, 1 }
  0x2f   : > { %s181_s6 = sand.u32 1, %s1005_s17   ;;  %s697_s7 = sshll.u32 %s1009_s18, 8 }
  0x30   : > { %p1146_p12 = por %p1384_p10, %p39_p1  ;;  %s675_s8 = sshll.u32 %s181_s6, 4 }
  0x31   : > { %s1155_s10 = scalar_lea.hbm %s1371_s0, %s697_s7  ;;  %s185_s25 = scalar_lea.vmem [#allocation2], %s675_s8 }
  0x32   : > { %s192_s28 = sshll.u32 %s185_s25, 4  ;;  %p1157_p11 = pnand %p773_p6, %p41_p8  ;;  %s1161_s28 = int_to_ptr.vmem [resolvable:$true] %s192_s28 }
  0x33   : > { %s1163_s11 = scalar_lea.sflag [#allocation3], %s181_s6  ;;  %s849_s12 = scalar_lea.hbm %s1155_s10, 256 }
  0x34   : > { %p850_p13 = scmp.ne.s32.totalorder %s1155_s10, %s849_s12  ;;  %p851_p0 = pneg %p1157_p11 }
  0x35   : > { %s854_s24 = scalar_lea.hbm %s1371_s0, 512  ;;  %p855_p7 = scmp.lt.u32.totalorder %s1155_s10, %s1371_s0 }
  0x36   : > { %p852_p3 = pnand %p851_p0, %p850_p13  ;;  %p856_p9 = scmp.lt.u32.totalorder %s854_s24, %s849_s12 }
  0x37   : > { %p858_p1 = scmp.lt.u32.totalorder %s849_s12, %s1155_s10 }
  0x38   : > { %p853_p5 = pneg %p852_p3  ;;  %p857_p2 = por %p856_p9, %p855_p7 }
  0x3a   : > { %p859_p4 = por %p858_p1, %p857_p2 }
  0x3c   : > { %p860_p6 = pnand %p859_p4, %p853_p5 }
  0x3e   : > { %863 = shalt.err (!%p860_p6)
}
  0x3f   : > { %s864_s6 = scalar_lea.vmem %s1161_s28, 256  ;;  %s1014_s26 = smov [#allocation2]  }
  0x40   : > { %p865_p8 = scmp.ne.s32.totalorder %s1161_s28, %s864_s6  ;;  %s869_s9 = sshll.u32 %s1014_s26, 4  ;;  %s870_s9 = int_to_ptr.vmem [resolvable:$false] %s869_s9 }
  0x41   : > { %s871_s25 = scalar_lea.vmem %s870_s9, 512  ;;  %p872_p3 = scmp.lt.s32.totalorder %s1161_s28, %s870_s9 }
  0x42   : > { %p867_p10 = pnand %p865_p8, %p851_p0  ;;  %p873_p7 = scmp.lt.s32.totalorder %s871_s25, %s864_s6 }
  0x44   : > { %p868_p13 = pneg %p867_p10  ;;  %p874_p9 = por %p873_p7, %p872_p3 }
  0x46   : > { %p875_p2 = pnand %p874_p9, %p868_p13 }
  0x48   : > { %878 = shalt.err (!%p875_p2)
}
  0x49   : > { %s1015_s12 = smov 32   ;;  %s1016_s13 = smov 2  }
  0x4a   : > { %761 = dma.hbm_to_vmem [thread:$0]  (!%p1157_p11), %s1155_s10, 256, %s1161_s28, %s1163_s11, %s1015_s12, %s1015_s12, %s1016_s13  }
  0x4b   : > { %p1387_p0 = scmp.ne.s32.totalorder %s1382_s23, 0 }
  0x4c   : > { %s1194_s14 = sand.u32 (!%p1387_p0), 1, %s1001_s16   ;;  %p1388_p5 = scmp.ne.s32.totalorder (!%p1387_p0), %s1380_s21, 0 }
  0x4d   : > { %204 = sbr.rel (%p1387_p0) target bundleno = 479 (0x1df), region = 28  ;;  %s1197_s24 = sshll.u32 (!%p1387_p0), %s1194_s14, 4 }
  0x4e   : > { %s207_s7 = scalar_lea.sflag (!%p1387_p0), [#allocation3], %s1194_s14  ;;  %s1201_s8 = scalar_lea.vmem (!%p1387_p0), [#allocation2], %s1197_s24 }
  0x54   : > { %980 = dma.done.wait (%p1388_p5), %s207_s7, 256  }
  0x55   : > { %982 = vsyncadd (%p1388_p5), %s207_s7, 4294967040  ;;  %p1389_p11 = scmp.eq.s32.totalorder %s1074_s19, 0 }
  0x57   : > { %984 = dma.done.wait (%p1389_p11), [#allocation6], 512   ;;  %p1390_p1 = pmov %p1389_p11 }
  0x58   : > { %v1017_v0 = vmov 0.0|0.0   ;;  %vm1018_vm0 = vmmov 0   ;;  %v1019_v1 = vmov 0.0   ;;  %v258_v2 = vld [vmem:[#allocation5] sm:$0xff]  ;;  %v259_v3 = vld [vmem:[#allocation5 + $0x8] sm:$0xff]  ;;  %v260_v4 = vld [vmem:[#allocation5 + $0x10] sm:$0xff] }
  0x59   : > { %986 = vsyncadd (%p1390_p1), [#allocation6], 4294966784  ;;  %730 = vmatprep.subr.bf16.mxu0 %v1017_v0  ;;  %736 = vmatprep.subr.bf16.mxu1 %v1017_v0  ;;  %v731_v5 = vpack.c.bf16 %v259_v3, %v258_v2  ;;  %v261_v6 = vld [vmem:[#allocation5 + $0x18] sm:$0xff]  ;;  %v250_v7 = vld [vmem:[%s1201_s8] sm:$0x3]  ;;  %vm271_vm1 = vcmask 1041409  }
  0x5a   : > { %716 = vmatprep.mubr.msk.f32.mxu0 %vm1018_vm0, %v1019_v1  ;;  %727 = vmatprep.mubr.msk.f32.mxu1 %vm1018_vm0, %v1019_v1  ;;  %v251_v8 = vld [vmem:[%s1201_s8 + $0x2] sm:$0x3]  ;;  %v252_v9 = vld [vmem:[%s1201_s8 + $0x4] sm:$0x3]  ;;  %v253_v10 = vld [vmem:[%s1201_s8 + $0x6] sm:$0x3]  ;;  %v734_v12 = vpack.c.bf16 %v261_v6, %v260_v4 }
  0x5b   : > { %v254_v11 = vld [vmem:[%s1201_s8 + $0x8] sm:$0x3]  ;;  %732 = vmatpush3.bf16.msra.mxu0 %v731_v5  ;;  %738 = vmatpush3.bf16.msra.mxu1 %v731_v5  ;;  %v255_v13 = vld [vmem:[%s1201_s8 + $0xa] sm:$0x3]  ;;  %vm274_vm2 = vcmask 1042434   ;;  %vm277_vm3 = vcmask 1043459  }
  0x5c   : > { %vm280_vm4 = vcmask 1044484   ;;  %733 = vmatprep.subr.bf16.mxu0 %v1017_v0  ;;  %739 = vmatprep.subr.bf16.mxu1 %v1017_v0  ;;  %v256_v14 = vld [vmem:[%s1201_s8 + $0xc] sm:$0x3]  ;;  %v270_v15 = vrot.slane %v251_v8, 7  ;;  %v273_v16 = vrot.slane %v252_v9, 6  ;;  %v276_v17 = vrot.slane %v253_v10, 5 }
  0x5d   : > { %vm283_vm5 = vcmask 1045509   ;;  %v257_v18 = vld [vmem:[%s1201_s8 + $0xe] sm:$0x3]  ;;  %v279_v19 = vrot.slane %v254_v11, 4  ;;  %v282_v20 = vrot.slane %v255_v13, 3  ;;  %vm286_vm6 = vcmask 1046534  }
  0x5e   : > { %v375_v21 = vrot.slane %v250_v7, 1  ;;  %v272_v22 = vsel %vm271_vm1, %v270_v15, %v250_v7  ;;  %v377_v23 = vrot.slane %v252_v9, 7  ;;  %v379_v24 = vrot.slane %v253_v10, 6  ;;  %s234_s21 = scalar_lea.vmem [#allocation7], %s1197_s24  ;;  %s1233_s10 = sshll.u32 %s1074_s19, 7 }
  0x5f   : > { %v381_v25 = vrot.slane %v254_v11, 5  ;;  %735 = vmatpush3.bf16.msra.mxu0 %v734_v12  ;;  %v275_v26 = vsel %vm274_vm2, %v273_v16, %v272_v22  ;;  %v285_v27 = vrot.slane %v256_v14, 2  ;;  %741 = vmatpush3.bf16.msra.mxu1 %v734_v12  ;;  %v383_v29 = vrot.slane %v255_v13, 4  ;;  %s497_s23 = sshll.u32 %s234_s21, 4  ;;  %s1241_s11 = scalar_lea.hbm %s1373_s2, %s1233_s10  ;;  %s1235_s23 = int_to_ptr.vmem [resolvable:$true] %s497_s23 }
  0x60   : > { %v376_v28 = vsel %vm271_vm1, %v251_v8, %v375_v21  ;;  %v278_v30 = vsel %vm277_vm3, %v276_v17, %v275_v26  ;;  %v288_v31 = vrot.slane %v257_v18, 1  ;;  %v385_v33 = vrot.slane %v256_v14, 3  ;;  %s1020_s6 = smov 96   ;;  %s1021_s26 = smov 112  }
  0x61   : > { %v378_v32 = vsel %vm274_vm2, %v377_v23, %v376_v28  ;;  %v281_v34 = vsel %vm280_vm4, %v279_v19, %v278_v30  ;;  %vm289_vm7 = vcmask 1047559   ;;  %v387_v36 = vrot.slane %v257_v18, 2  ;;  %s475_s9 = scalar_lea.sflag [#allocation4], %s1194_s14  ;;  %s879_s25 = scalar_lea.vmem %s1235_s23, 256 }
  0x62   : > { %v380_v35 = vsel %vm277_vm3, %v379_v24, %v378_v32  ;;  %v284_v37 = vsel %vm283_vm5, %v282_v20, %v281_v34  ;;  %vm291_vm8 = vcmask 261120   ;;  %vm364_vm9 = vcmask 130048   ;;  %p880_p4 = scmp.ne.s32.totalorder %s1235_s23, %s879_s25  ;;  %s1022_s12 = smov [#allocation7]  }
  0x63   : > { %v382_v38 = vsel %vm280_vm4, %v381_v25, %v380_v35  ;;  %v287_v39 = vsel %vm286_vm6, %v285_v27, %v284_v37  ;;  %s883_s13 = sshll.u32 %s1022_s12, 4  ;;  %s884_s13 = int_to_ptr.vmem [resolvable:$false] %s883_s13 }
  0x64   : > { %v384_v40 = vsel %vm283_vm5, %v383_v29, %v382_v38  ;;  %v290_v41 = vsel %vm289_vm7, %v288_v31, %v287_v39  ;;  %p881_p6 = pnand %p880_p4, %p1146_p12  ;;  %s885_s7 = scalar_lea.vmem %s884_s13, 512 }
  0x65   : > { %v386_v42 = vsel %vm286_vm6, %v385_v33, %v384_v40  ;;  %717 = vmatmul.mubr.msk.f32.vlgmr.msra.gmra.mrb[0].mxu0 %vm291_vm8, %v290_v41  ;;  %p886_p10 = scmp.lt.s32.totalorder %s1235_s23, %s884_s13  ;;  %p887_p13 = scmp.lt.s32.totalorder %s885_s7, %s879_s25 }
  0x66   : > { %v388_v43 = vsel %vm289_vm7, %v387_v36, %v386_v42  ;;  %p882_p8 = pneg %p881_p6 }
  0x67   : > { %728 = vmatmul.mubr.msk.f32.vlgmr.msra.gmra.mrb[0].mxu1 %vm291_vm8, %v388_v43  ;;  %p888_p3 = por %p887_p13, %p886_p10 }
  0x69   : > { %p889_p7 = pnand %p888_p3, %p882_p8 }
 0x138   : > { %v360_v44 = vpop.f32.mrb[0].mxu0 }
 0x139   : > { %365 = vst.msk [vmem:[%s234_s21] sm:$0xff] %vm364_vm9, %v360_v44  ;;  %371 = vrot.lane.b32.xlu1 %v360_v44, %s1020_s6  ;;  %367 = vrot.lane.b32.xlu0 %v360_v44, %s1021_s26  ;;  %v718_v45 = vpop.f32.mrb[1].mxu0 }
 0x13a   : > { %v457_v46 = vpop.f32.mrb[0].mxu1 }
 0x13b   : > { %686 = vst.msk [vmem:[%s234_s21 + $0x8] sm:$0xff] %vm364_vm9, %v457_v46  ;;  %v729_v47 = vpop.f32.mrb[1].mxu1 }
 0x13c   : > { %892 = shalt.err (!%p889_p7)
}
 0x13d   : > { %s893_s8 = scalar_lea.hbm %s1241_s11, 256  ;;  %s897_s29 = scalar_lea.hbm %s1373_s2, 512 }
 0x13e   : > { %p894_p9 = scmp.ne.s32.totalorder %s1241_s11, %s893_s8  ;;  %p898_p5 = scmp.lt.u32.totalorder %s1241_s11, %s1373_s2 }
 0x13f   : > { %p899_p11 = scmp.lt.u32.totalorder %s897_s29, %s893_s8  ;;  %p901_p4 = scmp.lt.u32.totalorder %s893_s8, %s1241_s11 }
 0x140   : > { %p895_p2 = pnand %p894_p9, %p1146_p12 }
 0x141   : > { %p900_p1 = por %p899_p11, %p898_p5 }
 0x142   : > { %p896_p0 = pneg %p895_p2 }
 0x143   : > { %p902_p6 = por %p901_p4, %p900_p1 }
 0x145   : > { %p903_p8 = pnand %p902_p6, %p896_p0 }
 0x147   : > { %906 = shalt.err (!%p903_p8)
}
 0x148   : > { %s1023_s25 = smov 128   ;;  %s1024_s7 = smov 256   ;;  %469 = vrot.lane.b32.xlu1 %v457_v46, %s1020_s6  ;;  %464 = vrot.lane.b32.xlu0 %v457_v46, %s1021_s26 }
 0x149   : > { %s1025_s21 = smov 8   ;;  %s241_s8 = scalar_lea.vmem [#allocation8], %s1197_s24 }
 0x14a   : > { %748 = dma.vmem_to_hbm [thread:$0]  (%p1146_p12), %s1235_s23, 256, %s1241_s11, %s475_s9, %s1023_s25, %s1024_s7, %s1025_s21  }
 0x14b   : > { %s512_s28 = sshll.u32 %s241_s8, 4  ;;  %s479_s29 = sand.u32 1, %s1074_s19   ;;  %s1281_s28 = int_to_ptr.vmem [resolvable:$true] %s512_s28 }
 0x14c   : > { %s248_s12 = scalar_lea.vmem [#allocation10], %s1197_s24  ;;  %s1287_s11 = scalar_lea.hbm %s1374_s3, %s1233_s10 }
 0x14d   : > { %s527_s13 = sshll.u32 %s248_s12, 4  ;;  %s1295_s6 = scalar_lea.hbm %s1375_s4, %s1233_s10  ;;  %s1289_s13 = int_to_ptr.vmem [resolvable:$true] %s527_s13 }
 0x14e   : > { %s1299_s26 = scalar_lea.sflag [#allocation9], %s479_s29  ;;  %s907_s9 = scalar_lea.vmem %s1281_s28, 256 }
 0x14f   : > { %p908_p10 = scmp.ne.s32.totalorder %s1281_s28, %s907_s9  ;;  %s1026_s14 = smov [#allocation8]  }
 0x150   : > { %s911_s23 = sshll.u32 %s1026_s14, 4  ;;  %s912_s23 = int_to_ptr.vmem [resolvable:$false] %s911_s23 }
 0x151   : > { %p909_p13 = pnand %p908_p10, %p1146_p12  ;;  %s913_s20 = scalar_lea.vmem %s912_s23, 512 }
 0x152   : > { %p914_p7 = scmp.lt.s32.totalorder %s1281_s28, %s912_s23  ;;  %p915_p9 = scmp.lt.s32.totalorder %s913_s20, %s907_s9 }
 0x153   : > { %p910_p3 = pneg %p909_p13 }
 0x154   : > { %p916_p2 = por %p915_p9, %p914_p7 }
 0x156   : > { %p917_p0 = pnand %p916_p2, %p910_p3 }
 0x1ab   : > { %v372_v48 = vpop.permute.xlu1 %371  ;;  %v368_v49 = vpop.permute.xlu0 %367 }
 0x1ac   : > { %374 = vst.msk [vmem:[%s248_s12] sm:$0xff] %vm364_vm9, %v372_v48  ;;  %370 = vst.msk [vmem:[%s241_s8] sm:$0xff] %vm364_vm9, %v368_v49 }
 0x1ba   : > { %v470_v50 = vpop.permute.xlu1 %469  ;;  %v465_v51 = vpop.permute.xlu0 %464 }
 0x1bb   : > { %688 = vst.msk [vmem:[%s248_s12 + $0x8] sm:$0xff] %vm364_vm9, %v470_v50  ;;  %687 = vst.msk [vmem:[%s241_s8 + $0x8] sm:$0xff] %vm364_vm9, %v465_v51 }
 0x1bc   : > { %920 = shalt.err (!%p917_p0)
}
 0x1bd   : > { %s921_s10 = scalar_lea.hbm %s1287_s11, 256  ;;  %s925_s12 = scalar_lea.hbm %s1374_s3, 512 }
 0x1be   : > { %p922_p5 = scmp.ne.s32.totalorder %s1287_s11, %s921_s10  ;;  %p926_p4 = scmp.lt.u32.totalorder %s1287_s11, %s1374_s3 }
 0x1bf   : > { %p927_p6 = scmp.lt.u32.totalorder %s925_s12, %s921_s10  ;;  %p929_p10 = scmp.lt.u32.totalorder %s921_s10, %s1287_s11 }
 0x1c0   : > { %p923_p11 = pnand %p922_p5, %p1146_p12 }
 0x1c1   : > { %p928_p8 = por %p927_p6, %p926_p4 }
 0x1c2   : > { %p924_p1 = pneg %p923_p11 }
 0x1c3   : > { %p930_p13 = por %p929_p10, %p928_p8 }
 0x1c5   : > { %p931_p3 = pnand %p930_p13, %p924_p1 }
 0x1c7   : > { %934 = shalt.err (!%p931_p3)
}
 0x1c8   : > { %749 = dma.vmem_to_hbm [thread:$0]  (%p1146_p12), %s1281_s28, 256, %s1287_s11, %s1299_s26, %s1023_s25, %s1024_s7, %s1025_s21  }
 0x1c9   : > { %s935_s20 = scalar_lea.vmem %s1289_s13, 256  ;;  %s1027_s9 = smov [#allocation10]  }
 0x1ca   : > { %p936_p7 = scmp.ne.s32.totalorder %s1289_s13, %s935_s20  ;;  %s939_s14 = sshll.u32 %s1027_s9, 4  ;;  %s940_s14 = int_to_ptr.vmem [resolvable:$false] %s939_s14 }
 0x1cb   : > { %s941_s23 = scalar_lea.vmem %s940_s14, 512  ;;  %p942_p0 = scmp.lt.s32.totalorder %s1289_s13, %s940_s14 }
 0x1cc   : > { %p937_p9 = pnand %p936_p7, %p1146_p12  ;;  %p943_p5 = scmp.lt.s32.totalorder %s941_s23, %s935_s20 }
 0x1ce   : > { %p938_p2 = pneg %p937_p9  ;;  %p944_p11 = por %p943_p5, %p942_p0 }
 0x1d0   : > { %p945_p1 = pnand %p944_p11, %p938_p2 }
 0x1d2   : > { %948 = shalt.err (!%p945_p1)
}
 0x1d3   : > { %s949_s28 = scalar_lea.hbm %s1295_s6, 256  ;;  %s953_s8 = scalar_lea.hbm %s1375_s4, 512 }
 0x1d4   : > { %p950_p4 = scmp.ne.s32.totalorder %s1295_s6, %s949_s28  ;;  %p954_p10 = scmp.lt.u32.totalorder %s1295_s6, %s1375_s4 }
 0x1d5   : > { %p955_p13 = scmp.lt.u32.totalorder %s953_s8, %s949_s28  ;;  %p957_p7 = scmp.lt.u32.totalorder %s949_s28, %s1295_s6 }
 0x1d6   : > { %p951_p6 = pnand %p950_p4, %p1146_p12 }
 0x1d7   : > { %p956_p3 = por %p955_p13, %p954_p10 }
 0x1d8   : > { %p952_p8 = pneg %p951_p6 }
 0x1d9   : > { %p958_p9 = por %p957_p7, %p956_p3 }
 0x1db   : > { %p959_p2 = pnand %p958_p9, %p952_p8 }
 0x1dd   : > { %962 = shalt.err (!%p959_p2)
}
 0x1de   : > { %750 = dma.vmem_to_hbm [thread:$0]  (%p1146_p12), %s1289_s13, 256, %s1295_s6, %s1299_s26, %s1023_s25, %s1024_s7, %s1025_s21  }
 0x1df PF: > { %s542_s19 = sand.u32 1, %s997_s15   ;;  %p1391_p0 = scmp.ne.s32.totalorder %s1381_s22, 0 }
 0x1e0   : > { %p1392_p5 = scmp.ge.s32.totalorder %s1009_s18, 2  ;;  %s543_s24 = scalar_lea.sflag [#allocation4], %s542_s19 }
 0x1e2   : > { %p763_p11 = pnand %p1392_p5, %p1391_p0 }
 0x1e4   : > { %988 = dma.done.wait (!%p763_p11), %s543_s24, 256  }
 0x1e5   : > { %990 = vsyncadd (!%p763_p11), %s543_s24, 4294967040  ;;  %s1393_s5 = sadd.s32 4294967294, %s1009_s18  }
 0x1e6   : > { %s551_s20 = sand.u32 1, %s1393_s5  }
 0x1e7   : > { %s552_s9 = scalar_lea.sflag [#allocation9], %s551_s20 }
 0x1e8   : > { %992 = dma.done.wait (!%p763_p11), %s552_s9, 512  }
 0x1e9   : > { %994 = vsyncadd (!%p763_p11), %s552_s9, 4294966784  ;;  %p22_p12 = scmp.ge.s32.totalorder %s1111_s27, 4   ;;  %s1394_s15 = smov %s1001_s16 }
 0x1ea   : > { %s1395_s16 = smov %s1005_s17  ;;  %s1396_s17 = smov %s1142_s30 }
 0x1eb   : > { %s1397_s18 = smov %s1111_s27  ;;  %24 = sbr.rel (!%p22_p12) target bundleno = 8 (0x8), region = 112 }
 0x1f2   :  { %566 = vsyncpa [#allocation3], 1 }
 0x1f3   :  { %568 = vsyncpa [#allocation3 + $0x1], 1 }
 0x1f4   :  { %569 = vsyncpa [#allocation6], 1 }
 0x1f5   :  { %570 = vsyncpa [#allocation4], 1 }
 0x1f6   :  { %572 = vsyncpa [#allocation4 + $0x1], 1 }
 0x1f7   :  { %573 = vsyncpa [#allocation9], 1 }
 0x1f8   :  { %575 = vsyncpa [#allocation9 + $0x1], 1 }

</bundles_post_ra>
